<compile_context>
chip_gen: v7x
topology: tpu7x:2x2x1
jax: 0.10.0
libtpu: 0.0.40
codegen_flags: <defaults>
</compile_context>

<pallas_src>
import jax
import jax.numpy as jnp
from jax.experimental import pallas as pl
from jax.experimental.pallas import tpu as pltpu


def critic_kernel(state_ref, action_ref, w1s_ref, w1a_ref, b1_ref,
                  w2_ref, b2_ref, w3_ref, b3_ref, o_ref):
    # fc1 with the concat fused: x@W1 == state@W1[:S] + action@W1[S:]
    h1 = (jnp.dot(state_ref[...], w1s_ref[...], preferred_element_type=jnp.float32)
          + jnp.dot(action_ref[...], w1a_ref[...], preferred_element_type=jnp.float32)
          + b1_ref[...])
    h1 = jnp.maximum(h1, 0.0)

    h2 = jnp.dot(h1, w2_ref[...], preferred_element_type=jnp.float32) + b2_ref[...]
    h2 = jnp.maximum(h2, 0.0)

    # fc3 (64 -> 1): VPU elementwise mul + lane reduction instead of an N=1
    # MXU matmul (avoids MXU push/drain latency on the critical path).
    out = jnp.sum(h2 * w3_ref[...], axis=-1, keepdims=True) + b3_ref[0, 0]
    o_ref[...] = out.astype(o_ref.dtype)


def critic_forward(state, action, params, *, tile_b=512):
    """state: (B, state_shape), action: (B, n_actions) -> (B, 1)."""
    w1, b1, w2, b2, w3, b3 = params
    state = state.astype(jnp.float32)
    action = action.astype(jnp.float32)

    B, S = state.shape
    A = action.shape[1]
    H = w1.shape[1]

    # Split fc1 weights at trace time -> concatenation is fused into the kernel.
    w1_s = w1[:S]
    w1_a = w1[S:]
    # fc3 weight as a (1, H) row for the VPU mul + lane-reduce path.
    w3_row = w3.reshape(1, H)

    # Batch tile: multiple of 8 (sublane) when tiling; full batch when small
    # (a full-extent block is always layout-legal).
    tb = B if B <= tile_b else tile_b
    grid = (pl.cdiv(B, tb),)

    batch_spec = lambda feat: pl.BlockSpec((tb, feat), lambda i: (i, 0))
    resident = lambda shape: pl.BlockSpec(shape, lambda i: (0, 0))

    return pl.pallas_call(
        critic_kernel,
        grid=grid,
        out_shape=jax.ShapeDtypeStruct((B, 1), jnp.float32),
        in_specs=[
            batch_spec(S),                       # state tile
            batch_spec(A),                       # action tile
            resident((S, H)),                    # w1[:S]   (stays resident in VMEM)
            resident((A, H)),                    # w1[S:]
            resident((1, H)),                    # b1
            resident((H, H)),                    # w2
            resident((1, H)),                    # b2
            resident((1, H)),                    # w3 row
            pl.BlockSpec(memory_space=pltpu.MemorySpace.SMEM),  # b3 scalar
        ],
        out_specs=pl.BlockSpec((tb, 1), lambda i: (i, 0)),
        compiler_params=pltpu.CompilerParams(
            dimension_semantics=("parallel",),
            vmem_limit_bytes=32 * 1024 * 1024,
        ),
    )(state, action, w1_s, w1_a, b1, w2, b2, w3_row, b3)


def init_params(key, state_shape, n_actions, hidden=64):
    """Deterministic init matching PyTorch nn.Linear default (U[-1/sqrt(fan_in), 1/sqrt(fan_in)])."""
    d_in = state_shape + n_actions
    keys = jax.random.split(key, 6)

    def uniform(k, shape, fan_in):
        bound = 1.0 / jnp.sqrt(jnp.float32(fan_in))
        return jax.random.uniform(k, shape, jnp.float32, -bound, bound)

    w1 = uniform(keys[0], (d_in, hidden), d_in)
    b1 = uniform(keys[1], (1, hidden), d_in)
    w2 = uniform(keys[2], (hidden, hidden), hidden)
    b2 = uniform(keys[3], (1, hidden), hidden)
    w3 = uniform(keys[4], (hidden, 1), hidden)
    b3 = uniform(keys[5], (1, 1), hidden)
    return (w1, b1, w2, b2, w3, b3)


def critic_ref(state, action, params):
    """Pure-JAX reference of the PyTorch forward for validation."""
    w1, b1, w2, b2, w3, b3 = params
    x = jnp.concatenate([state, action], axis=-1).astype(jnp.float32)
    h1 = jax.nn.relu(x @ w1 + b1)
    h2 = jax.nn.relu(h1 @ w2 + b2)
    return h2 @ w3 + b3


if __name__ == "__main__":
    # Small shapes consistent with the module: args.state_shape=24, args.n_actions=8
    STATE_SHAPE, N_ACTIONS = 24, 8

    key = jax.random.PRNGKey(0)
    k_state, k_action, k_params = jax.random.split(key, 3)
    params = init_params(k_params, STATE_SHAPE, N_ACTIONS)

    # 1) Tiny batch (single grid step).
    B = 8
    state = jax.random.normal(k_state, (B, STATE_SHAPE), jnp.float32)
    action = jax.random.normal(k_action, (B, N_ACTIONS), jnp.float32)

    out = jax.block_until_ready(critic_forward(state, action, params))
    ref = critic_ref(state, action, params)
    assert out.shape == (B, 1), out.shape
    assert jnp.allclose(out, ref, atol=1e-5, rtol=1e-5), (
        f"max abs err {jnp.max(jnp.abs(out - ref))}"
    )

    # 2) Slightly larger batch with a small tile to exercise the batch grid
    #    (5 grid steps of 16 rows each).
    B2 = 80
    state2 = jax.random.normal(jax.random.PRNGKey(1), (B2, STATE_SHAPE), jnp.float32)
    action2 = jax.random.normal(jax.random.PRNGKey(2), (B2, N_ACTIONS), jnp.float32)

    out2 = jax.block_until_ready(critic_forward(state2, action2, params, tile_b=16))
    ref2 = critic_ref(state2, action2, params)
    assert out2.shape == (B2, 1), out2.shape
    assert jnp.allclose(out2, ref2, atol=1e-5, rtol=1e-5), (
        f"max abs err {jnp.max(jnp.abs(out2 - ref2))}"
    )

    print("KERNEL_OK")
</pallas_src>

<mosaic_0001>
module attributes {stable_mosaic.version = 11 : i64} {
  func.func @critic_kernel(%arg0: i32, %arg1: memref<8x24xf32, #tpu.memory_space<vmem>>, %arg2: memref<8x8xf32, #tpu.memory_space<vmem>>, %arg3: memref<24x64xf32, #tpu.memory_space<vmem>>, %arg4: memref<8x64xf32, #tpu.memory_space<vmem>>, %arg5: memref<1x64xf32, #tpu.memory_space<vmem>>, %arg6: memref<64x64xf32, #tpu.memory_space<vmem>>, %arg7: memref<1x64xf32, #tpu.memory_space<vmem>>, %arg8: memref<1x64xf32, #tpu.memory_space<vmem>>, %arg9: memref<1x1xf32, #tpu.memory_space<smem>>, %arg10: memref<8x1xf32, #tpu.memory_space<vmem>>) attributes {dimension_semantics = [#tpu.dimension_semantics<parallel>], iteration_bounds = array<i64: 1>, scalar_prefetch = 0 : i64, scratch_operands = 0 : i64, tpu.core_type = #tpu.core_type<tc>, window_params = [{transform_indices = @transform_0, window_bounds = array<i64: 8, 24>}, {transform_indices = @transform_1, window_bounds = array<i64: 8, 8>}, {pipeline_mode = #tpu.pipeline_mode<synchronous>, transform_indices = @transform_2, window_bounds = array<i64: 24, 64>}, {pipeline_mode = #tpu.pipeline_mode<synchronous>, transform_indices = @transform_3, window_bounds = array<i64: 8, 64>}, {pipeline_mode = #tpu.pipeline_mode<synchronous>, transform_indices = @transform_4, window_bounds = array<i64: 1, 64>}, {pipeline_mode = #tpu.pipeline_mode<synchronous>, transform_indices = @transform_5, window_bounds = array<i64: 64, 64>}, {pipeline_mode = #tpu.pipeline_mode<synchronous>, transform_indices = @transform_6, window_bounds = array<i64: 1, 64>}, {pipeline_mode = #tpu.pipeline_mode<synchronous>, transform_indices = @transform_7, window_bounds = array<i64: 1, 64>}, {transform_indices = @transform_8, window_bounds = array<i64: 1, 1>}, {transform_indices = @transform_9, window_bounds = array<i64: 8, 1>}]} {
    %c0 = arith.constant 0 : index
    %c0_0 = arith.constant 0 : index
    %0 = vector.load %arg1[%c0, %c0_0] : memref<8x24xf32, #tpu.memory_space<vmem>>, vector<8x24xf32>
    %c0_1 = arith.constant 0 : index
    %c0_2 = arith.constant 0 : index
    %1 = vector.load %arg3[%c0_1, %c0_2] : memref<24x64xf32, #tpu.memory_space<vmem>>, vector<24x64xf32>
    %cst = arith.constant dense<0.000000e+00> : vector<8x64xf32>
    %2 = tpu.matmul %0, %1, %cst {dimension_numbers = #tpu.dot_dimension_numbers<[1], [0], [0], [1], [0, 0, 1, 1], [], []>} : vector<8x24xf32>, vector<24x64xf32>, vector<8x64xf32> -> vector<8x64xf32>
    %c0_3 = arith.constant 0 : index
    %c0_4 = arith.constant 0 : index
    %3 = vector.load %arg2[%c0_3, %c0_4] : memref<8x8xf32, #tpu.memory_space<vmem>>, vector<8x8xf32>
    %c0_5 = arith.constant 0 : index
    %c0_6 = arith.constant 0 : index
    %4 = vector.load %arg4[%c0_5, %c0_6] : memref<8x64xf32, #tpu.memory_space<vmem>>, vector<8x64xf32>
    %cst_7 = arith.constant dense<0.000000e+00> : vector<8x64xf32>
    %5 = tpu.matmul %3, %4, %cst_7 {dimension_numbers = #tpu.dot_dimension_numbers<[1], [0], [0], [1], [0, 0, 1, 1], [], []>} : vector<8x8xf32>, vector<8x64xf32>, vector<8x64xf32> -> vector<8x64xf32>
    %6 = arith.addf %2, %5 : vector<8x64xf32>
    %c0_8 = arith.constant 0 : index
    %c0_9 = arith.constant 0 : index
    %7 = vector.load %arg5[%c0_8, %c0_9] : memref<1x64xf32, #tpu.memory_space<vmem>>, vector<1x64xf32>
    %8 = vector.broadcast %7 : vector<1x64xf32> to vector<8x64xf32>
    %9 = arith.addf %6, %8 : vector<8x64xf32>
    %cst_10 = arith.constant 0.000000e+00 : f32
    %10 = vector.broadcast %cst_10 : f32 to vector<8x64xf32>
    %11 = arith.maximumf %9, %10 : vector<8x64xf32>
    %c0_11 = arith.constant 0 : index
    %c0_12 = arith.constant 0 : index
    %12 = vector.load %arg6[%c0_11, %c0_12] : memref<64x64xf32, #tpu.memory_space<vmem>>, vector<64x64xf32>
    %cst_13 = arith.constant dense<0.000000e+00> : vector<8x64xf32>
    %13 = tpu.matmul %11, %12, %cst_13 {dimension_numbers = #tpu.dot_dimension_numbers<[1], [0], [0], [1], [0, 0, 1, 1], [], []>} : vector<8x64xf32>, vector<64x64xf32>, vector<8x64xf32> -> vector<8x64xf32>
    %c0_14 = arith.constant 0 : index
    %c0_15 = arith.constant 0 : index
    %14 = vector.load %arg7[%c0_14, %c0_15] : memref<1x64xf32, #tpu.memory_space<vmem>>, vector<1x64xf32>
    %15 = vector.broadcast %14 : vector<1x64xf32> to vector<8x64xf32>
    %16 = arith.addf %13, %15 : vector<8x64xf32>
    %cst_16 = arith.constant 0.000000e+00 : f32
    %17 = vector.broadcast %cst_16 : f32 to vector<8x64xf32>
    %18 = arith.maximumf %16, %17 : vector<8x64xf32>
    %c0_17 = arith.constant 0 : index
    %c0_18 = arith.constant 0 : index
    %19 = vector.load %arg8[%c0_17, %c0_18] : memref<1x64xf32, #tpu.memory_space<vmem>>, vector<1x64xf32>
    %20 = vector.broadcast %19 : vector<1x64xf32> to vector<8x64xf32>
    %21 = arith.mulf %18, %20 : vector<8x64xf32>
    %cst_19 = arith.constant dense<0.000000e+00> : vector<8xf32>
    %22 = vector.multi_reduction <add>, %21, %cst_19 [1] : vector<8x64xf32> to vector<8xf32>
    %23 = vector.shape_cast %22 : vector<8xf32> to vector<8x1xf32>
    %c0_20 = arith.constant 0 : index
    %c0_21 = arith.constant 0 : index
    %24 = memref.load %arg9[%c0_20, %c0_21] : memref<1x1xf32, #tpu.memory_space<smem>>
    %25 = vector.broadcast %24 : f32 to vector<8x1xf32>
    %26 = arith.addf %23, %25 : vector<8x1xf32>
    %c0_22 = arith.constant 0 : index
    %c0_23 = arith.constant 0 : index
    %27 = vector.load %arg10[%c0_22, %c0_23] : memref<8x1xf32, #tpu.memory_space<vmem>>, vector<8x1xf32>
    tpu.vector_store %arg10[%c0_22, %c0_23], %26 {strides = array<i32>} : memref<8x1xf32, #tpu.memory_space<vmem>>, vector<8x1xf32>,
    return
  }
  func.func @transform_0(%arg0: i32) -> (i32, i32) {
    %c0_i32 = arith.constant 0 : i32
    %c0_i32_0 = arith.constant 0 : i32
    return %arg0, %c0_i32 : i32, i32
  }
  func.func @transform_1(%arg0: i32) -> (i32, i32) {
    %c0_i32 = arith.constant 0 : i32
    %c0_i32_0 = arith.constant 0 : i32
    return %arg0, %c0_i32 : i32, i32
  }
  func.func @transform_2(%arg0: i32) -> (i32, i32) {
    %c0_i32 = arith.constant 0 : i32
    %c0_i32_0 = arith.constant 0 : i32
    %c0_i32_1 = arith.constant 0 : i32
    return %c0_i32, %c0_i32_0 : i32, i32
  }
  func.func @transform_3(%arg0: i32) -> (i32, i32) {
    %c0_i32 = arith.constant 0 : i32
    %c0_i32_0 = arith.constant 0 : i32
    %c0_i32_1 = arith.constant 0 : i32
    return %c0_i32, %c0_i32_0 : i32, i32
  }
  func.func @transform_4(%arg0: i32) -> (i32, i32) {
    %c0_i32 = arith.constant 0 : i32
    %c0_i32_0 = arith.constant 0 : i32
    %c0_i32_1 = arith.constant 0 : i32
    return %c0_i32, %c0_i32_0 : i32, i32
  }
  func.func @transform_5(%arg0: i32) -> (i32, i32) {
    %c0_i32 = arith.constant 0 : i32
    %c0_i32_0 = arith.constant 0 : i32
    %c0_i32_1 = arith.constant 0 : i32
    return %c0_i32, %c0_i32_0 : i32, i32
  }
  func.func @transform_6(%arg0: i32) -> (i32, i32) {
    %c0_i32 = arith.constant 0 : i32
    %c0_i32_0 = arith.constant 0 : i32
    %c0_i32_1 = arith.constant 0 : i32
    return %c0_i32, %c0_i32_0 : i32, i32
  }
  func.func @transform_7(%arg0: i32) -> (i32, i32) {
    %c0_i32 = arith.constant 0 : i32
    %c0_i32_0 = arith.constant 0 : i32
    %c0_i32_1 = arith.constant 0 : i32
    return %c0_i32, %c0_i32_0 : i32, i32
  }
  func.func @transform_8(%arg0: i32) -> (i32, i32) {
    %c0_i32 = arith.constant 0 : i32
    %c0_i32_0 = arith.constant 0 : i32
    %c0_i32_1 = arith.constant 0 : i32
    return %c0_i32, %c0_i32_0 : i32, i32
  }
  func.func @transform_9(%arg0: i32) -> (i32, i32) {
    %c0_i32 = arith.constant 0 : i32
    %c0_i32_0 = arith.constant 0 : i32
    return %arg0, %c0_i32 : i32, i32
  }
}

</mosaic_0001>

<bundles_post_ra>
// kernel: tpu_custom_call.1
= control target key start
LH: loop header
LB: loop body
LE: loop exit
PB: predicated region body
PF: predicated region fallthrough
CT: control target
= control target key end

     0   :  { %15 = vsyncpa [#allocation4], 0  ;;  %s660_s0 = inlined_call_operand.hbm [shape: f32[8,24], index: 0, kind: input, shape index: {}]   ;;  %s661_s1 = inlined_call_operand.hbm [shape: f32[8,8], index: 1, kind: input, shape index: {}]   ;;  %s662_s2 = inlined_call_operand.hbm [shape: f32[24,64], index: 2, kind: input, shape index: {}]   ;;  %s663_s3 = inlined_call_operand.vmem [shape: f32[8,64], index: 3, kind: input, shape index: {}]   ;;  %s664_s4 = inlined_call_operand.vmem [shape: f32[1,64], index: 4, kind: input, shape index: {}]   ;;  %s665_s5 = inlined_call_operand.hbm [shape: f32[64,64], index: 5, kind: input, shape index: {}]   ;;  %s666_s6 = inlined_call_operand.vmem [shape: f32[1,64], index: 6, kind: input, shape index: {}]   ;;  %s667_s7 = inlined_call_operand.vmem [shape: f32[1,64], index: 7, kind: input, shape index: {}]   ;;  %s668_s8 = inlined_call_operand.<no memory space> [shape: f32[1,1], index: 8, kind: input, shape index: {}]   ;;  %s669_s9 = inlined_call_operand.vmem [shape: f32[8,1], index: 9, kind: output, shape index: {}]  }
   0x1   :  { %16 = vsyncpa [#allocation6], 0 }
   0x2   :  { %17 = vsyncpa [#allocation9], 0  ;;  %s532_s30 = smov [#allocation5]   ;;  %s533_s11 = smov [#allocation3]  }
   0x3   :  { %s34_s10 = sshll.u32 %s532_s30, 4  ;;  %s24_s12 = sshll.u32 %s533_s11, 4  ;;  %s35_s10 = int_to_ptr.vmem [resolvable:$true] %s34_s10  ;;  %s25_s12 = int_to_ptr.vmem [resolvable:$true] %s24_s12 }
   0x4   :  { %s438_s15 = scalar_lea.hbm %s661_s1, 128 }
   0x5   :  { %p439_p0 = scmp.ne.s32.totalorder %s661_s1, %s438_s15  ;;  %p442_p1 = scmp.lt.u32.totalorder %s438_s15, %s661_s1 }
   0x7   :  { %p444_p2 = pnand %p442_p1, %p439_p0 }
   0x9   :  { %447 = shalt.err (!%p444_p2)
}
   0xa   :  { %s448_s20 = scalar_lea.vmem %s35_s10, 128  ;;  %p453_p4 = scmp.lt.s32.totalorder %s35_s10, %s35_s10 }
   0xb   :  { %p449_p3 = scmp.ne.s32.totalorder %s35_s10, %s448_s20  ;;  %p454_p5 = scmp.lt.s32.totalorder %s448_s20, %s448_s20 }
   0xd   :  { %p455_p6 = por %p454_p5, %p453_p4 }
   0xf   :  { %p456_p7 = pnand %p455_p6, %p449_p3 }
  0x11   :  { %459 = shalt.err (!%p456_p7)
}
  0x12   :  { %37 = dma.hbm_to_vmem [thread:$0]  %s661_s1, 128, %s35_s10, [#allocation6]  }
  0x13   :  { %s460_s25 = scalar_lea.hbm %s660_s0, 128 }
  0x14   :  { %p461_p8 = scmp.ne.s32.totalorder %s660_s0, %s460_s25  ;;  %p464_p9 = scmp.lt.u32.totalorder %s460_s25, %s660_s0 }
  0x16   :  { %p466_p10 = pnand %p464_p9, %p461_p8 }
  0x18   :  { %469 = shalt.err (!%p466_p10)
}
  0x19   :  { %s470_s30 = scalar_lea.vmem %s25_s12, 128  ;;  %p475_p12 = scmp.lt.s32.totalorder %s25_s12, %s25_s12 }
  0x1a   :  { %p471_p11 = scmp.ne.s32.totalorder %s25_s12, %s470_s30  ;;  %p476_p13 = scmp.lt.s32.totalorder %s470_s30, %s470_s30 }
  0x1c   :  { %p477_p0 = por %p476_p13, %p475_p12 }
  0x1e   :  { %p478_p1 = pnand %p477_p0, %p471_p11 }
  0x20   :  { %481 = shalt.err (!%p478_p1)
}
  0x21   :  { %27 = dma.hbm_to_vmem [thread:$0]  %s660_s0, 128, %s25_s12, [#allocation4]  }
  0x22   :  { %s534_s11 = smov [#allocation7]   ;;  %s482_s16 = scalar_lea.hbm %s662_s2, 384 }
  0x23   :  { %s43_s13 = sshll.u32 %s534_s11, 4  ;;  %p483_p2 = scmp.ne.s32.totalorder %s662_s2, %s482_s16  ;;  %s44_s13 = int_to_ptr.vmem [resolvable:$true] %s43_s13 }
  0x24   :  { %p486_p3 = scmp.lt.u32.totalorder %s482_s16, %s662_s2 }
  0x26   :  { %p488_p4 = pnand %p486_p3, %p483_p2 }
  0x28   :  { %491 = shalt.err (!%p488_p4)
}
  0x29   :  { %s492_s21 = scalar_lea.vmem %s44_s13, 384  ;;  %p497_p6 = scmp.lt.s32.totalorder %s44_s13, %s44_s13 }
  0x2a   :  { %p493_p5 = scmp.ne.s32.totalorder %s44_s13, %s492_s21  ;;  %p498_p7 = scmp.lt.s32.totalorder %s492_s21, %s492_s21 }
  0x2c   :  { %p499_p8 = por %p498_p7, %p497_p6 }
  0x2e   :  { %p500_p9 = pnand %p499_p8, %p493_p5 }
  0x30   :  { %503 = shalt.err (!%p500_p9)
}
  0x31   :  { %s535_s0 = smov 128   ;;  %s536_s12 = smov 8  }
  0x32   :  { %49 = dma.hbm_to_vmem [thread:$0]  %s662_s2, 384, %s44_s13, [#allocation6], %s535_s0, %s535_s0, %s536_s12  }
  0x33   :  { %s537_s24 = smov [#allocation8]   ;;  %s504_s28 = scalar_lea.hbm %s665_s5, 1024 }
  0x34   :  { %s59_s25 = sshll.u32 %s537_s24, 4  ;;  %p505_p10 = scmp.ne.s32.totalorder %s665_s5, %s504_s28  ;;  %s60_s25 = int_to_ptr.vmem [resolvable:$true] %s59_s25 }
  0x35   :  { %p508_p11 = scmp.lt.u32.totalorder %s504_s28, %s665_s5 }
  0x37   :  { %p510_p12 = pnand %p508_p11, %p505_p10 }
  0x39   :  { %513 = shalt.err (!%p510_p12)
}
  0x3a   :  { %s514_s11 = scalar_lea.vmem %s60_s25, 1024  ;;  %p519_p0 = scmp.lt.s32.totalorder %s60_s25, %s60_s25 }
  0x3b   :  { %p515_p13 = scmp.ne.s32.totalorder %s60_s25, %s514_s11  ;;  %p520_p1 = scmp.lt.s32.totalorder %s514_s11, %s514_s11 }
  0x3d   :  { %p521_p2 = por %p520_p1, %p519_p0 }
  0x3f   :  { %p522_p3 = pnand %p521_p2, %p515_p13 }
  0x41   :  { %525 = shalt.err (!%p522_p3)
}
  0x42   :  { %65 = dma.hbm_to_vmem [thread:$0]  %s665_s5, 1024, %s60_s25, [#allocation9], %s535_s0, %s535_s0, %s536_s12  }
  0x43   :  { %526 = dma.done.wait [#allocation4], 128  }
  0x44   :  { %527 = vsyncadd [#allocation4], 4294967168 }
  0x45   :  { %528 = dma.done.wait [#allocation6], 512  }
  0x46   :  { %529 = vsyncadd [#allocation6], 4294966784 }
  0x47   :  { %530 = dma.done.wait [#allocation9], 1024  }
  0x48   :  { %531 = vsyncadd [#allocation9], 4294966272  ;;  %v538_v0 = vmov 0.0   ;;  %vm539_vm0 = vmmov 0   ;;  %v540_v1 = vmov 0.0|0.0   ;;  %vm90_vm1 = vcmask 64512  }
  0x49   :  { %381 = vmatprep.subr.mxu1 %v538_v0  ;;  %383 = vmatprep.mubr.msk.f32.mxu1 %vm539_vm0, %v538_v0  ;;  %v89_v2 = vld [vmem:[%s663_s3] sm:$0xff]  ;;  %v88_v3 = vld [vmem:[#allocation5] sm:$0xff]  ;;  %v85_v4 = vld [vmem:[#allocation7] sm:$0xff]  ;;  %vm164_vm2 = vcmask 195584   ;;  %vm262_vm3 = vcmask 523264   ;;  %v349_v37 = vstv %s668_s8  ;;  %vm351_vm4 = vcmask 7168  }
  0x4a   :  { %417 = vmatprep.subr.bf16.mxu0 %v540_v1  ;;  %411 = vmatprep.mubr.msk.f32.mxu0 %vm539_vm0, %v538_v0  ;;  %v86_v5 = vld [vmem:[#allocation7 + $0x8] sm:$0xff]  ;;  %v247_v7 = vld [vmem:[#allocation8] sm:$0xff]  ;;  %v248_v8 = vld [vmem:[#allocation8 + $0x8] sm:$0xff] }
  0x4b   :  { %382 = vmatpush3.msra.mxu1 %v89_v2  ;;  %v415_v6 = vpack.c.bf16 %v86_v5, %v85_v4  ;;  %v418_v9 = vpack.c.bf16 %v248_v8, %v247_v7  ;;  %v87_v10 = vld [vmem:[#allocation7 + $0x10] sm:$0xff]  ;;  %v249_v12 = vld [vmem:[#allocation8 + $0x10] sm:$0xff]  ;;  %v251_v15 = vld [vmem:[#allocation8 + $0x20] sm:$0xff] }
  0x4c   :  { %384 = vmatmul.mubr.msk.f32.vlgmr.msra.gmra.mrb[0].mxu1 %vm90_vm1, %v88_v3  ;;  %414 = vmatprep.subr.bf16.mxu1 %v540_v1  ;;  %v84_v11 = vld [vmem:[#allocation3] sm:$0xff]  ;;  %v252_v16 = vld [vmem:[#allocation8 + $0x28] sm:$0xff]  ;;  %v253_v18 = vld [vmem:[#allocation8 + $0x30] sm:$0xff] }
  0x4d   :  { %392 = vmatprep.mubr.msk.f32.mxu1 %vm539_vm0, %v538_v0  ;;  %416 = vmatpush3.bf16.msra.mxu1 %v415_v6  ;;  %v250_v13 = vld [vmem:[#allocation8 + $0x18] sm:$0xff]  ;;  %v424_v17 = vpack.c.bf16 %v252_v16, %v251_v15 }
  0x4e   :  { %390 = vmatprep.subr.mxu1 %v538_v0  ;;  %419 = vmatpush3.bf16.msra.mxu0 %v418_v9  ;;  %v421_v14 = vpack.c.bf16 %v250_v13, %v249_v12  ;;  %v254_v19 = vld [vmem:[#allocation8 + $0x38] sm:$0xff] }
  0x4f   :  { %420 = vmatprep.subr.bf16.mxu0 %v540_v1  ;;  %v427_v20 = vpack.c.bf16 %v254_v19, %v253_v18  ;;  %v362_v24 = vld [vmem:[%s664_s4] ss:$0 sm:$0xff] }
  0x50   :  { %v363_v29 = vld [vmem:[%s666_s6] ss:$0 sm:$0xff] }
  0x51   :  { %391 = vmatpush3.msra.mxu1 %v87_v10  ;;  %v365_v33 = vld [vmem:[%s667_s7] ss:$0 sm:$0xff] }
  0x52   :  { %393 = vmatmul.mubr.msk.f32.vlgmr.msra.gmra.mrb[2].mxu1 %vm164_vm2, %v84_v11  ;;  %422 = vmatpush3.bf16.msra.mxu0 %v421_v14 }
  0x53   :  { %423 = vmatprep.subr.bf16.mxu0 %v540_v1 }
  0x56   :  { %425 = vmatpush3.bf16.msra.mxu0 %v424_v17 }
  0x57   :  { %426 = vmatprep.subr.bf16.mxu0 %v540_v1 }
  0x5a   :  { %428 = vmatpush3.bf16.msra.mxu0 %v427_v20 }
 0x11f   :  { %v160_v21 = vpop.f32.mrb[0].mxu1 }
 0x120   :  { %v385_v22 = vpop.f32.mrb[1].mxu1 }
 0x125   :  { %v234_v23 = vpop.f32.mrb[2].mxu1 }
 0x126   :  { %v235_v25 = vadd.f32 %v234_v23, %v160_v21  ;;  %v394_v26 = vpop.f32.mrb[3].mxu1 }
 0x128   :  { %v245_v27 = vadd.f32 %v362_v24, %v235_v25 }
 0x12a   :  { %v246_v28 = vmax.f32 %v245_v27, 0.0 }
 0x12c   :  { %412 = vmatmul.mubr.msk.f32.vlgmr.msra.gmra.mrb[0].mxu0 %vm262_vm3, %v246_v28 }
 0x1ff   :  { %v332_v30 = vpop.f32.mrb[0].mxu0 }
 0x200   :  { %v333_v31 = vadd.f32 %v363_v29, %v332_v30  ;;  %v413_v32 = vpop.f32.mrb[1].mxu0 }
 0x202   :  { %v336_v34 = vmax.f32 %v333_v31, 0.0 }
 0x204   :  { %v344_v35 = vmul.f32 %v365_v33, %v336_v34 }
 0x206   :  { %v345_v36 = vsel %vm262_vm3, %v344_v35, 0.0 }
 0x207   :  { %346 = vadd.xlane.f32.xlu0 %v345_v36 }
 0x294   :  { %v347_v38 = vpop.xlane.xlu0 %346 }
 0x295   :  { %v350_v39 = vadd.f32 %v349_v37, %v347_v38 }
 0x297   :  { %352 = vst.msk [vmem:[%s669_s9] sm:$0xff] %vm351_vm4, %v350_v39 }
 0x298   :  { %357 = vsyncpa [#allocation4], 1 }
 0x299   :  { %358 = vsyncpa [#allocation6], 1 }
 0x29a   :  { %359 = vsyncpa [#allocation9], 1 }

</bundles_post_ra>
